<compile_context>
chip_gen: v6e
topology: v6e:2x2x1
jax: 0.10.0
libtpu: 0.0.40
codegen_flags: <defaults>
</compile_context>

<pallas_src>
import functools

import jax
import jax.numpy as jnp
from jax.experimental import pallas as pl
from jax.experimental.pallas import tpu as pltpu


def _round_up(n, m):
    return ((n + m - 1) // m) * m


def _pad2d(x, rows, cols):
    r, c = x.shape
    return jnp.pad(x, ((0, rows - r), (0, cols - c)))


def _gennn_fused_kernel(*refs, acts, widths):
    """Fused whole-MLP kernel.

    refs = (x_ref, w0_ref, ..., w{L-1}_ref, bias_pack_ref, o_ref)
    acts: static per-layer activations in {'none','relu','tanh','exp'}
          ('exp' only on the last layer; its negation is folded into W/b).
    widths: static per-layer (padded) output widths; used to slice the packed
          bias array.  Zero-padded hidden lanes stay exactly zero through every
          layer (zero weight cols/rows + zero bias + act(0)=0), so padding
          never contaminates the real 16-wide output.
    """
    x_ref = refs[0]
    bias_ref = refs[-2]
    o_ref = refs[-1]
    w_refs = refs[1:-2]

    h = x_ref[...]
    biases = bias_ref[...]  # single (8, 128) load; rows = per-layer biases
    for k, act in enumerate(acts):  # static Python loop -> fully unrolled
        w = w_refs[k][...]
        b = biases[k:k + 1, : widths[k]]
        y = jnp.dot(h, w, preferred_element_type=jnp.float32) + b
        if act == "none":
            h = y
        elif act == "relu":
            h = jnp.maximum(y, 0.0)
        elif act == "tanh":
            h = jnp.tanh(y)
        elif act == "exp":
            h = jnp.exp(y)  # final-layer sign already folded into (w, b)
        else:
            raise ValueError(f"unknown activation: {act}")
    o_ref[...] = h.astype(o_ref.dtype)


def init_gennn_params(key, layers):
    """nn.Linear-shaped params, W stored transposed as (l1, l2), b as (1, l2).

    Init mimics PyTorch's default U(-1/sqrt(fan_in), 1/sqrt(fan_in)).
    """
    params = []
    for l1, l2 in zip(layers, layers[1:]):
        key, kw, kb = jax.random.split(key, 3)
        bound = 1.0 / jnp.sqrt(jnp.float32(l1))
        w = jax.random.uniform(kw, (l1, l2), jnp.float32, -bound, bound)
        b = jax.random.uniform(kb, (1, l2), jnp.float32, -bound, bound)
        params.append((w, b))
    return params


def prepare_gennn_params(params):
    """Pad only the HIDDEN dims to multiples of 128 (input/output dims stay
    unpadded so HBM activation traffic stays minimal), fold the last-layer
    negation exp(-lin(x)) == exp(x @ (-W) + (-b)), and pack all biases into a
    single (8, pack_w) array (row k = bias of layer k, zero-padded)."""
    L = len(params)
    dims = [params[0][0].shape[0]] + [w.shape[1] for w, _ in params]
    pdims = [dims[0]] + [_round_up(d, 128) for d in dims[1:-1]] + [dims[-1]]
    pack_w = max(128, max(_round_up(d, 128) for d in dims[1:]))

    ws = []
    bias_pack = jnp.zeros((_round_up(max(L, 1), 8), pack_w), jnp.float32)
    for k, (w, b) in enumerate(params):
        sign = jnp.float32(-1.0 if k == L - 1 else 1.0)
        ws.append(_pad2d(sign * w, pdims[k], pdims[k + 1]))
        bias_pack = bias_pack.at[k, : dims[k + 1]].set(sign * b.reshape(-1))
    return ws, bias_pack, dims, pdims


def gennn_forward(alpha, params, avtn_lst, batch_tile=1024):
    """Forward pass of GenNN as a single fused Pallas TPU kernel.

    k < L-1:  activation = act_k(Linear_k(activation))   (act may be 'None')
    k = L-1:  activation = exp(-Linear_k(activation))
    (`it_ind` from the PyTorch signature is unused by the reference forward.)

    B <= batch_tile: one grid-less invocation, every operand whole in VMEM.
    B >  batch_tile: batch-tiled grid (>= 2 steps) marked "parallel" so the two
    TensorCores on v7x each take part of the batch; weights/biases are
    VMEM-resident across all grid steps via constant index_maps.
    """
    L = len(params)
    acts = tuple(
        ("none" if avtn_lst[k] == "None" else avtn_lst[k]) for k in range(L - 1)
    ) + ("exp",)
    ws, bias_pack, dims, pdims = prepare_gennn_params(params)
    widths = tuple(pdims[1:])
    kernel = functools.partial(_gennn_fused_kernel, acts=acts, widths=widths)

    B, d_in = alpha.shape
    assert d_in == dims[0], (d_in, dims[0])
    d_out = dims[-1]
    n_in = 1 + L + 1  # x, L weights, packed bias

    if B <= batch_tile:
        # Grid-less path: no software-pipeline prologue/epilogue for a kernel
        # this small.  Pad only the batch dim (to a sublane multiple).
        b_pad = _round_up(B, 8)
        x = jnp.pad(alpha, ((0, b_pad - B), (0, 0)))
        out = pl.pallas_call(
            kernel,
            out_shape=jax.ShapeDtypeStruct((b_pad, d_out), jnp.float32),
            in_specs=[pl.BlockSpec(memory_space=pltpu.MemorySpace.VMEM)] * n_in,
            out_specs=pl.BlockSpec(memory_space=pltpu.MemorySpace.VMEM),
        )(x, *ws, bias_pack)
    else:
        # Batch-tiled path: grid over B (>= 2 steps since B > batch_tile),
        # weights/bias replicated (constant index_map) so they stay resident.
        b_pad = _round_up(B, batch_tile)
        x = jnp.pad(alpha, ((0, b_pad - B), (0, 0)))
        in_specs = [pl.BlockSpec((batch_tile, dims[0]), lambda i: (i, 0))]
        for k in range(L):
            in_specs.append(
                pl.BlockSpec((pdims[k], pdims[k + 1]), lambda i: (0, 0))
            )
        in_specs.append(pl.BlockSpec(bias_pack.shape, lambda i: (0, 0)))
        out = pl.pallas_call(
            kernel,
            out_shape=jax.ShapeDtypeStruct((b_pad, d_out), jnp.float32),
            grid=(b_pad // batch_tile,),
            in_specs=in_specs,
            out_specs=pl.BlockSpec((batch_tile, d_out), lambda i: (i, 0)),
            compiler_params=pltpu.CompilerParams(
                dimension_semantics=("parallel",)
            ),
        )(x, *ws, bias_pack)

    # Feature dim is already unpadded; only drop padded batch rows.
    return out[:B]


def gennn_reference(alpha, params, avtn_lst):
    """Pure-JAX reference for correctness checking."""
    x = alpha
    L = len(params)
    for k, (w, b) in enumerate(params):
        y = x @ w + b
        if k < L - 1:
            if avtn_lst[k] == "None":
                x = y
            elif avtn_lst[k] == "relu":
                x = jnp.maximum(y, 0.0)
            elif avtn_lst[k] == "tanh":
                x = jnp.tanh(y)
        else:
            x = jnp.exp(-y)
    return x


if __name__ == "__main__":
    key = jax.random.PRNGKey(0)

    # GenNN(Layers=[4, 32, 32, 16]); per-layer activations for non-final layers.
    layers = [4, 32, 32, 16]
    avtn_lst = ["tanh", "relu"]

    key, k_params, k_a0, k_a1, k_a2 = jax.random.split(key, 5)
    params = init_gennn_params(k_params, layers)

    # Small batch -> single fused, grid-less kernel path.
    batch = 8
    alpha = jax.random.normal(k_a0, (batch, layers[0]), jnp.float32)
    out = jax.block_until_ready(gennn_forward(alpha, params, avtn_lst))
    ref = gennn_reference(alpha, params, avtn_lst)
    assert out.shape == (batch, layers[-1]), out.shape
    assert jnp.allclose(out, ref, atol=1e-5, rtol=1e-5), float(
        jnp.max(jnp.abs(out - ref))
    )

    # Larger batch (multiple of the tile) -> 2-step "parallel" grid so both
    # TensorCores on v7x get work.
    big_batch = 2048
    alpha_big = jax.random.normal(k_a1, (big_batch, layers[0]), jnp.float32)
    out_big = jax.block_until_ready(
        gennn_forward(alpha_big, params, avtn_lst, batch_tile=1024)
    )
    ref_big = gennn_reference(alpha_big, params, avtn_lst)
    assert out_big.shape == (big_batch, layers[-1]), out_big.shape
    assert jnp.allclose(out_big, ref_big, atol=1e-5, rtol=1e-5), float(
        jnp.max(jnp.abs(out_big - ref_big))
    )

    # Ragged batch -> exercises batch-row padding + final row slice in the
    # tiled path (padded rows are garbage and must be dropped).
    odd_batch = 1203
    alpha_odd = jax.random.normal(k_a2, (odd_batch, layers[0]), jnp.float32)
    out_odd = jax.block_until_ready(
        gennn_forward(alpha_odd, params, avtn_lst, batch_tile=1024)
    )
    ref_odd = gennn_reference(alpha_odd, params, avtn_lst)
    assert out_odd.shape == (odd_batch, layers[-1]), out_odd.shape
    assert jnp.allclose(out_odd, ref_odd, atol=1e-5, rtol=1e-5), float(
        jnp.max(jnp.abs(out_odd - ref_odd))
    )

    print("KERNEL_OK")
</pallas_src>

<mosaic_0001>
module attributes {stable_mosaic.version = 11 : i64} {
  func.func @_gennn_fused_kernel(%arg0: memref<8x4xf32, #tpu.memory_space<vmem>>, %arg1: memref<4x128xf32, #tpu.memory_space<vmem>>, %arg2: memref<128x128xf32, #tpu.memory_space<vmem>>, %arg3: memref<128x16xf32, #tpu.memory_space<vmem>>, %arg4: memref<8x128xf32, #tpu.memory_space<vmem>>, %arg5: memref<8x16xf32, #tpu.memory_space<vmem>>) attributes {dimension_semantics = [], scalar_prefetch = 0 : i64, scratch_operands = 0 : i64, tpu.core_type = #tpu.core_type<tc>} {
    %c0 = arith.constant 0 : index
    %c0_0 = arith.constant 0 : index
    %0 = vector.load %arg0[%c0, %c0_0] : memref<8x4xf32, #tpu.memory_space<vmem>>, vector<8x4xf32>
    %c0_1 = arith.constant 0 : index
    %c0_2 = arith.constant 0 : index
    %1 = vector.load %arg4[%c0_1, %c0_2] : memref<8x128xf32, #tpu.memory_space<vmem>>, vector<8x128xf32>
    %c0_3 = arith.constant 0 : index
    %c0_4 = arith.constant 0 : index
    %2 = vector.load %arg1[%c0_3, %c0_4] : memref<4x128xf32, #tpu.memory_space<vmem>>, vector<4x128xf32>
    %3 = vector.extract_strided_slice %1 {offsets = [0, 0], sizes = [1, 128], strides = [1, 1]} : vector<8x128xf32> to vector<1x128xf32>
    %cst = arith.constant dense<0.000000e+00> : vector<8x128xf32>
    %4 = tpu.matmul %0, %2, %cst {dimension_numbers = #tpu.dot_dimension_numbers<[1], [0], [0], [1], [0, 0, 1, 1], [], []>} : vector<8x4xf32>, vector<4x128xf32>, vector<8x128xf32> -> vector<8x128xf32>
    %5 = vector.broadcast %3 : vector<1x128xf32> to vector<8x128xf32>
    %6 = arith.addf %4, %5 : vector<8x128xf32>
    %7 = math.tanh %6 : vector<8x128xf32>
    %c0_5 = arith.constant 0 : index
    %c0_6 = arith.constant 0 : index
    %8 = vector.load %arg2[%c0_5, %c0_6] : memref<128x128xf32, #tpu.memory_space<vmem>>, vector<128x128xf32>
    %9 = vector.extract_strided_slice %1 {offsets = [1, 0], sizes = [1, 128], strides = [1, 1]} : vector<8x128xf32> to vector<1x128xf32>
    %cst_7 = arith.constant dense<0.000000e+00> : vector<8x128xf32>
    %10 = tpu.matmul %7, %8, %cst_7 {dimension_numbers = #tpu.dot_dimension_numbers<[1], [0], [0], [1], [0, 0, 1, 1], [], []>} : vector<8x128xf32>, vector<128x128xf32>, vector<8x128xf32> -> vector<8x128xf32>
    %11 = vector.broadcast %9 : vector<1x128xf32> to vector<8x128xf32>
    %12 = arith.addf %10, %11 : vector<8x128xf32>
    %cst_8 = arith.constant 0.000000e+00 : f32
    %13 = vector.broadcast %cst_8 : f32 to vector<8x128xf32>
    %14 = arith.maximumf %12, %13 : vector<8x128xf32>
    %c0_9 = arith.constant 0 : index
    %c0_10 = arith.constant 0 : index
    %15 = vector.load %arg3[%c0_9, %c0_10] : memref<128x16xf32, #tpu.memory_space<vmem>>, vector<128x16xf32>
    %16 = vector.extract_strided_slice %1 {offsets = [2, 0], sizes = [1, 16], strides = [1, 1]} : vector<8x128xf32> to vector<1x16xf32>
    %cst_11 = arith.constant dense<0.000000e+00> : vector<8x16xf32>
    %17 = tpu.matmul %14, %15, %cst_11 {dimension_numbers = #tpu.dot_dimension_numbers<[1], [0], [0], [1], [0, 0, 1, 1], [], []>} : vector<8x128xf32>, vector<128x16xf32>, vector<8x16xf32> -> vector<8x16xf32>
    %18 = vector.broadcast %16 : vector<1x16xf32> to vector<8x16xf32>
    %19 = arith.addf %17, %18 : vector<8x16xf32>
    %20 = math.exp %19 : vector<8x16xf32>
    %c0_12 = arith.constant 0 : index
    %c0_13 = arith.constant 0 : index
    %21 = vector.load %arg5[%c0_12, %c0_13] : memref<8x16xf32, #tpu.memory_space<vmem>>, vector<8x16xf32>
    tpu.vector_store %arg5[%c0_12, %c0_13], %20 {strides = array<i32>} : memref<8x16xf32, #tpu.memory_space<vmem>>, vector<8x16xf32>,
    return
  }
}

</mosaic_0001>

<bundles_post_ra>
// kernel: tpu_custom_call.1
= control target key start
LH: loop header
LB: loop body
LE: loop exit
PB: predicated region body
PF: predicated region fallthrough
CT: control target
= control target key end

     0   :  { %vm32_vm0 = vcmask 1043456   ;;  %v448_v2 = vmov 0.0   ;;  %vm449_vm1 = vmmov 0   ;;  %vm28_vm2 = vcmask 31744   ;;  %s628_s0 = inlined_call_operand.vmem [shape: f32[8,4], index: 0, kind: input, shape index: {}]   ;;  %s629_s1 = inlined_call_operand.vmem [shape: f32[4,128], index: 1, kind: input, shape index: {}]   ;;  %s630_s2 = inlined_call_operand.vmem [shape: f32[128,128], index: 2, kind: input, shape index: {}]   ;;  %s631_s3 = inlined_call_operand.vmem [shape: f32[128,16], index: 3, kind: input, shape index: {}]   ;;  %s632_s4 = inlined_call_operand.vmem [shape: f32[8,128], index: 4, kind: input, shape index: {}]   ;;  %s633_s5 = inlined_call_operand.hbm [shape: f32[8,16], index: 5, kind: output, shape index: {}]  }
   0x1   :  { %v23_v0 = vld [vmem:[%s629_s1] sm:$0xf]  ;;  %344 = vmatprep.subr.mxu0 %v448_v2  ;;  %346 = vmatprep.mubr.msk.f32.mxu0 %vm449_vm1, %v448_v2  ;;  %v122_v3 = vld [vmem:[%s630_s2 + $0x78] sm:$0xff]  ;;  %v121_v4 = vld [vmem:[%s630_s2 + $0x70] sm:$0xff] }
   0x2   :  { %v21_v1 = vld [vmem:[%s628_s0] sm:$0xff]  ;;  %345 = vmatpush3.msk.msra.mxu0 %vm32_vm0, %v23_v0  ;;  %349 = vmatprep.subr.mxu1 %v448_v2 }
   0x3   :  { %347 = vmatmul.mubr.msk.f32.vlgmr.msra.gmra.mxu0 %vm28_vm2, %v21_v1  ;;  %350 = vmatpush3.msra.mxu1 %v122_v3 }
   0x4   :  { %10 = vsyncpa [#allocation3], 0  ;;  %351 = vmatprep.subr.mxu1 %v448_v2  ;;  %v120_v5 = vld [vmem:[%s630_s2 + $0x68] sm:$0xff]  ;;  %381 = vmatprep.mubr.msk.f32.mxu1 %vm449_vm1, %v448_v2  ;;  %v119_v6 = vld [vmem:[%s630_s2 + $0x60] sm:$0xff]  ;;  %v24_v32 = vlaneseq  ;;  %s450_s30 = smov [#allocation2]   ;;  %vm290_vm3 = vcmask 130048  }
   0x5   :  { %352 = vmatpush3.msra.mxu1 %v121_v4  ;;  %384 = vmatprep.subr.mxu0 %v448_v2  ;;  %v118_v7 = vld [vmem:[%s630_s2 + $0x58] sm:$0xff]  ;;  %v117_v8 = vld [vmem:[%s630_s2 + $0x50] sm:$0xff]  ;;  %v116_v9 = vld [vmem:[%s630_s2 + $0x48] sm:$0xff] }
   0x6   :  { %353 = vmatprep.subr.mxu1 %v448_v2  ;;  %416 = vmatprep.mubr.msk.f32.mxu0 %vm449_vm1, %v448_v2  ;;  %v115_v10 = vld [vmem:[%s630_s2 + $0x40] sm:$0xff]  ;;  %v114_v11 = vld [vmem:[%s630_s2 + $0x38] sm:$0xff]  ;;  %v113_v12 = vld [vmem:[%s630_s2 + $0x30] sm:$0xff]  ;;  %v25_v33 = vshrl.u32 %v24_v32, 7 }
   0x7   :  { %354 = vmatpush3.msra.mxu1 %v120_v5  ;;  %v112_v13 = vld [vmem:[%s630_s2 + $0x28] sm:$0xff]  ;;  %v111_v14 = vld [vmem:[%s630_s2 + $0x20] sm:$0xff]  ;;  %v110_v15 = vld [vmem:[%s630_s2 + $0x18] sm:$0xff] }
   0x8   :  { %355 = vmatprep.subr.mxu1 %v448_v2  ;;  %v109_v16 = vld [vmem:[%s630_s2 + $0x10] sm:$0xff]  ;;  %v108_v17 = vld [vmem:[%s630_s2 + $0x8] sm:$0xff]  ;;  %v107_v18 = vld [vmem:[%s630_s2] sm:$0xff]  ;;  %v26_v34 = vsub.s32 0, %v25_v33  ;;  %v125_v44 = vsub.s32 1, %v25_v33  ;;  %v216_v50 = vsub.s32 2, %v25_v33 }
   0x9   :  { %356 = vmatpush3.msra.mxu1 %v119_v6  ;;  %v213_v19 = vld [vmem:[%s631_s3 + $0x78] sm:$0xff]  ;;  %v212_v20 = vld [vmem:[%s631_s3 + $0x70] sm:$0xff]  ;;  %v211_v21 = vld [vmem:[%s631_s3 + $0x68] sm:$0xff]  ;;  %s298_s2 = sshll.u32 %s450_s30, 4  ;;  %s299_s2 = int_to_ptr.vmem [resolvable:$true] %s298_s2 }
   0xa   :  { %357 = vmatprep.subr.mxu1 %v448_v2  ;;  %385 = vmatpush3.msra.mxu0 %v213_v19  ;;  %v210_v22 = vld [vmem:[%s631_s3 + $0x60] sm:$0xff]  ;;  %v209_v23 = vld [vmem:[%s631_s3 + $0x58] sm:$0xff]  ;;  %v208_v24 = vld [vmem:[%s631_s3 + $0x50] sm:$0xff]  ;;  %p431_p1 = scmp.lt.s32.totalorder %s299_s2, %s299_s2 }
   0xb   :  { %358 = vmatpush3.msra.mxu1 %v118_v7  ;;  %386 = vmatprep.subr.mxu0 %v448_v2  ;;  %v207_v25 = vld [vmem:[%s631_s3 + $0x48] sm:$0xff]  ;;  %v206_v26 = vld [vmem:[%s631_s3 + $0x40] sm:$0xff]  ;;  %v205_v27 = vld [vmem:[%s631_s3 + $0x38] sm:$0xff] }
   0xc   :  { %359 = vmatprep.subr.mxu1 %v448_v2  ;;  %387 = vmatpush3.msra.mxu0 %v212_v20  ;;  %v204_v28 = vld [vmem:[%s631_s3 + $0x30] sm:$0xff]  ;;  %v203_v29 = vld [vmem:[%s631_s3 + $0x28] sm:$0xff]  ;;  %v202_v30 = vld [vmem:[%s631_s3 + $0x20] sm:$0xff] }
   0xd   :  { %360 = vmatpush3.msra.mxu1 %v117_v8  ;;  %388 = vmatprep.subr.mxu0 %v448_v2  ;;  %v201_v31 = vld [vmem:[%s631_s3 + $0x18] sm:$0xff]  ;;  %v22_v35 = vld [vmem:[%s632_s4] sm:$0xff]  ;;  %v200_v41 = vld [vmem:[%s631_s3 + $0x10] sm:$0xff] }
   0xe   :  { %361 = vmatprep.subr.mxu1 %v448_v2  ;;  %389 = vmatpush3.msra.mxu0 %v211_v21  ;;  %v27_v36 = vrot.slane %v22_v35, %v26_v34  ;;  %v199_v42 = vld [vmem:[%s631_s3 + $0x8] sm:$0xff]  ;;  %v198_v43 = vld [vmem:[%s631_s3] sm:$0xff]  ;;  %v126_v45 = vrot.slane %v22_v35, %v125_v44  ;;  %v217_v51 = vrot.slane %v22_v35, %v216_v50  ;;  %s426_s3 = scalar_lea.vmem %s299_s2, 128 }
   0xf   :  { %362 = vmatpush3.msra.mxu1 %v116_v9  ;;  %390 = vmatprep.subr.mxu0 %v448_v2  ;;  %p427_p0 = scmp.ne.s32.totalorder %s299_s2, %s426_s3  ;;  %p432_p2 = scmp.lt.s32.totalorder %s426_s3, %s426_s3 }
  0x10   :  { %363 = vmatprep.subr.mxu1 %v448_v2  ;;  %391 = vmatpush3.msra.mxu0 %v210_v22 }
  0x11   :  { %364 = vmatpush3.msra.mxu1 %v115_v10  ;;  %392 = vmatprep.subr.mxu0 %v448_v2  ;;  %p433_p3 = por %p432_p2, %p431_p1 }
  0x12   :  { %365 = vmatprep.subr.mxu1 %v448_v2  ;;  %393 = vmatpush3.msra.mxu0 %v209_v23 }
  0x13   :  { %366 = vmatpush3.msra.mxu1 %v114_v11  ;;  %394 = vmatprep.subr.mxu0 %v448_v2  ;;  %p434_p4 = pnand %p433_p3, %p427_p0 }
  0x14   :  { %367 = vmatprep.subr.mxu1 %v448_v2  ;;  %395 = vmatpush3.msra.mxu0 %v208_v24 }
  0x15   :  { %368 = vmatpush3.msra.mxu1 %v113_v12  ;;  %396 = vmatprep.subr.mxu0 %v448_v2 }
  0x16   :  { %369 = vmatprep.subr.mxu1 %v448_v2  ;;  %397 = vmatpush3.msra.mxu0 %v207_v25 }
  0x17   :  { %370 = vmatpush3.msra.mxu1 %v112_v13  ;;  %398 = vmatprep.subr.mxu0 %v448_v2 }
  0x18   :  { %371 = vmatprep.subr.mxu1 %v448_v2  ;;  %399 = vmatpush3.msra.mxu0 %v206_v26 }
  0x19   :  { %372 = vmatpush3.msra.mxu1 %v111_v14  ;;  %400 = vmatprep.subr.mxu0 %v448_v2 }
  0x1a   :  { %373 = vmatprep.subr.mxu1 %v448_v2  ;;  %401 = vmatpush3.msra.mxu0 %v205_v27 }
  0x1b   :  { %374 = vmatpush3.msra.mxu1 %v110_v15  ;;  %402 = vmatprep.subr.mxu0 %v448_v2 }
  0x1c   :  { %375 = vmatprep.subr.mxu1 %v448_v2  ;;  %403 = vmatpush3.msra.mxu0 %v204_v28 }
  0x1d   :  { %376 = vmatpush3.msra.mxu1 %v109_v16  ;;  %404 = vmatprep.subr.mxu0 %v448_v2 }
  0x1e   :  { %377 = vmatprep.subr.mxu1 %v448_v2  ;;  %405 = vmatpush3.msra.mxu0 %v203_v29 }
  0x1f   :  { %378 = vmatpush3.msra.mxu1 %v108_v17  ;;  %406 = vmatprep.subr.mxu0 %v448_v2 }
  0x20   :  { %379 = vmatprep.subr.mxu1 %v448_v2  ;;  %407 = vmatpush3.msra.mxu0 %v202_v30 }
  0x21   :  { %380 = vmatpush3.msra.mxu1 %v107_v18  ;;  %408 = vmatprep.subr.mxu0 %v448_v2 }
  0x22   :  { %409 = vmatpush3.msra.mxu0 %v201_v31 }
  0x23   :  { %410 = vmatprep.subr.mxu0 %v448_v2 }
  0x24   :  { %411 = vmatpush3.msra.mxu0 %v200_v41 }
  0x25   :  { %412 = vmatprep.subr.mxu0 %v448_v2 }
  0x26   :  { %413 = vmatpush3.msra.mxu0 %v199_v42 }
  0x27   :  { %414 = vmatprep.subr.mxu0 %v448_v2 }
  0x28   :  { %415 = vmatpush3.msra.mxu0 %v198_v43 }
  0xc3   :  { %v102_v37 = vpop.f32.mrf.mxu0 }
  0xc4   :  { %v103_v38 = vadd.f32 %v102_v37, %v27_v36 }
  0xc5   :  { %v348_v39 = vpop.f32.mrf.mxu0 }
  0xc6   :  { %422 = vtanh.f32 %v103_v38 }
  0xd3   :  { %v423_v40 = vpop.eup %422 }
  0xd4   :  { %382 = vmatmul.mubr.f32.vlgmr.msra.gmra.mxu1 %v423_v40 }
 0x194   :  { %v193_v46 = vpop.f32.mrf.mxu1 }
 0x195   :  { %v194_v47 = vadd.f32 %v193_v46, %v126_v45 }
 0x196   :  { %v383_v48 = vpop.f32.mrf.mxu1 }
 0x197   :  { %v197_v49 = vmax.f32 %v194_v47, 0.0 }
 0x199   :  { %417 = vmatmul.mubr.f32.vlgmr.msra.gmra.mxu0 %v197_v49 }
 0x259   :  { %v284_v52 = vpop.f32.mrf.mxu0 }
 0x25a   :  { %v285_v53 = vadd.f32 %v284_v52, %v217_v51 }
 0x25b   :  { %v418_v54 = vpop.f32.mrf.mxu0 }
 0x25c   :  { %v288_v55 = vmul.f32 1.442695, %v285_v53 }
 0x25e   :  { %424 = vpow2.f32 %v288_v55 }
 0x26b   :  { %v425_v56 = vpop.eup %424 }
 0x26c   :  { %291 = vst.msk [vmem:[#allocation2] sm:$0xff] %vm290_vm3, %v425_v56 }
 0x26d   :  { %437 = shalt.err (!%p434_p4)
}
 0x26e   :  { %301 = dma.vmem_to_hbm [thread:$0]  %s299_s2, 128, %s633_s5, [#allocation3]  }
 0x26f   :  { %446 = dma.done.wait [#allocation3], 128  }
 0x270   :  { %447 = vsyncadd [#allocation3], 4294967168 }
 0x271   :  { %305 = vsyncpa [#allocation3], 1 }

</bundles_post_ra>
